<compile_context>
chip_gen: v5e
topology: v5e:2x2
jax: 0.10.0
libtpu: 0.0.40
codegen_flags: <defaults>
</compile_context>

<pallas_src>
import functools

import jax
import jax.numpy as jnp
from jax.experimental import pallas as pl
from jax.experimental.pallas import tpu as pltpu


def _round_up(v, m):
    return (v + m - 1) // m * m


def _encoder_gather_update_kernel(x_ref, m_ref, wx_ref, wm_ref, b_ref, o_ref, *,
                                  compute_dtype):
    # Two MXU contractions into one f32 accumulator (one extra push/drain,
    # far cheaper than materializing a [x | m] concat copy in VMEM).
    acc = jnp.dot(x_ref[...].astype(compute_dtype), wx_ref[...],
                  preferred_element_type=jnp.float32)
    acc = acc + jnp.dot(m_ref[...].astype(compute_dtype), wm_ref[...],
                        preferred_element_type=jnp.float32)
    # f32 epilogue: bias add + ReLU (v5e has no bf16 VPU path).
    acc = acc + b_ref[...]                      # (1, h) broadcasts over rows
    o_ref[...] = jnp.maximum(acc, 0.0).astype(o_ref.dtype)


def pack_params(weight, bias, *, compute_dtype=jnp.bfloat16):
    """One-time (parameter-load-time) reformat of nn.Linear(2H, H) params.

    weight: (H, 2H) PyTorch layout, bias: (H,).  Returns the x-half and the
    m-half transposed to input-major (H, H) in the matmul compute dtype, plus
    a (1, H) f32 bias.  Runs ONCE, not per forward call; no padding needed.
    """
    h, two_h = weight.shape
    assert two_h == 2 * h and bias.shape == (h,)
    wx = jnp.asarray(weight[:, :h].T, dtype=compute_dtype)   # (H_in, H_out)
    wm = jnp.asarray(weight[:, h:].T, dtype=compute_dtype)   # (H_in, H_out)
    b = jnp.asarray(bias, dtype=jnp.float32).reshape(1, h)
    return wx, wm, b


def _choose_tile_n(n, tile_n_max):
    # Big tiles amortize the ~0.35 us per-grid-step cost, but make sure the
    # row grid has >= 4 steps when n allows it so v7x's two TensorCores both
    # get work under dimension_semantics=("parallel",).
    target_steps = 4
    t = _round_up(max(1, -(-n // target_steps)), 8)
    return max(8, min(int(tile_n_max), t))


def encoder_gather_update(x, m, wx, wm, b, *, tile_n=1024,
                          compute_dtype=jnp.bfloat16, out_dtype=None):
    """h = relu(Linear_{2H->H}(concat([x, m], 1))) with pre-packed params."""
    n, h = x.shape
    assert m.shape == (n, h)
    assert wx.shape == (h, h) and wm.shape == (h, h) and b.shape == (1, h)
    out_dtype = x.dtype if out_dtype is None else out_dtype

    tile_n = _choose_tile_n(n, tile_n)
    grid = (pl.cdiv(n, tile_n),)

    in_bytes = jnp.dtype(x.dtype).itemsize
    out_bytes = jnp.dtype(out_dtype).itemsize
    cd_bytes = jnp.dtype(compute_dtype).itemsize

    # VMEM budget: double-buffered x/m/out row tiles + resident weight halves
    # + bias + f32 accumulator + headroom.  Only raise the scoped limit above
    # the conservative 32 MiB default when needed, and never above the
    # device's physical VMEM (v7x has only 64 MiB).
    vmem_need = (
        2 * 2 * tile_n * h * in_bytes        # x, m (double-buffered)
        + 2 * tile_n * h * out_bytes         # out   (double-buffered)
        + 2 * 2 * h * h * cd_bytes           # wx, wm resident (buffered)
        + 2 * h * 4                          # bias
        + tile_n * h * 4                     # f32 accumulator
        + (2 << 20)                          # scratch headroom
    )
    cp_kwargs = dict(dimension_semantics=("parallel",))
    if vmem_need > (32 << 20):
        try:
            vmem_cap = int(pltpu.get_tpu_info().vmem_capacity_bytes)
        except Exception:
            vmem_cap = 64 << 20              # conservative (v7x) fallback
        cp_kwargs["vmem_limit_bytes"] = int(
            min(vmem_need, max(32 << 20, vmem_cap - (8 << 20))))

    # Advisory cost from the TRUE (n, h) dims (not padded).
    cost = pl.CostEstimate(
        flops=2 * n * (2 * h) * h,
        transcendentals=0,
        bytes_accessed=(2 * n * h * in_bytes     # x, m
                        + 2 * h * h * cd_bytes   # wx, wm
                        + h * 4                  # bias
                        + n * h * out_bytes),    # out
    )

    return pl.pallas_call(
        functools.partial(_encoder_gather_update_kernel,
                          compute_dtype=compute_dtype),
        out_shape=jax.ShapeDtypeStruct((n, h), out_dtype),
        grid=grid,
        in_specs=[
            pl.BlockSpec((tile_n, h), lambda i: (i, 0)),   # x row tile
            pl.BlockSpec((tile_n, h), lambda i: (i, 0)),   # m row tile
            pl.BlockSpec((h, h), lambda i: (0, 0)),        # W_x (resident)
            pl.BlockSpec((h, h), lambda i: (0, 0)),        # W_m (resident)
            pl.BlockSpec((1, h), lambda i: (0, 0)),        # bias (resident)
        ],
        out_specs=pl.BlockSpec((tile_n, h), lambda i: (i, 0)),
        compiler_params=pltpu.CompilerParams(**cp_kwargs),
        cost_estimate=cost,
    )(x, m, wx, wm, b)


if __name__ == "__main__":
    hidden = 32
    n_nodes = 10          # deliberately not a multiple of 8 -> ragged row tail

    key = jax.random.PRNGKey(0)
    kx, km, kw, kb = jax.random.split(key, 4)

    # Node data: x (tree-node features), m (aggregated incoming messages).
    # (The DGL gather / message aggregation happens upstream of this module.)
    x = jax.random.normal(kx, (n_nodes, hidden), dtype=jnp.float32)
    m = jax.random.normal(km, (n_nodes, hidden), dtype=jnp.float32)

    # Synthetic nn.Linear(2*hidden, hidden) parameters (PyTorch layout).
    bound = 1.0 / jnp.sqrt(2.0 * hidden)
    weight = jax.random.uniform(kw, (hidden, 2 * hidden),
                                minval=-bound, maxval=bound, dtype=jnp.float32)
    bias = jax.random.uniform(kb, (hidden,), minval=-bound, maxval=bound,
                              dtype=jnp.float32)

    # Pure-JAX reference (same semantics as the PyTorch module).
    ref = jnp.maximum(jnp.concatenate([x, m], axis=1) @ weight.T + bias, 0.0)

    # f32 compute path: tight check.
    wx32, wm32, b32 = pack_params(weight, bias, compute_dtype=jnp.float32)
    out32 = jax.block_until_ready(
        encoder_gather_update(x, m, wx32, wm32, b32,
                              compute_dtype=jnp.float32))
    assert out32.shape == (n_nodes, hidden)
    assert jnp.allclose(out32, ref, atol=1e-5, rtol=1e-5)

    # bf16 activations end-to-end (halves HBM bytes; MXU computes bf16 anyway).
    wxb, wmb, bb = pack_params(weight, bias, compute_dtype=jnp.bfloat16)
    outbf = jax.block_until_ready(
        encoder_gather_update(x.astype(jnp.bfloat16), m.astype(jnp.bfloat16),
                              wxb, wmb, bb, compute_dtype=jnp.bfloat16,
                              out_dtype=jnp.bfloat16))
    assert outbf.shape == (n_nodes, hidden)
    assert jnp.allclose(outbf.astype(jnp.float32), ref, atol=5e-2, rtol=5e-2)

    print("KERNEL_OK")
</pallas_src>

<mosaic_0001>
module attributes {stable_mosaic.version = 11 : i64} {
  func.func @_encoder_gather_update_kernel(%arg0: i32, %arg1: memref<8x32xf32, #tpu.memory_space<vmem>>, %arg2: memref<8x32xf32, #tpu.memory_space<vmem>>, %arg3: memref<32x32xf32, #tpu.memory_space<vmem>>, %arg4: memref<32x32xf32, #tpu.memory_space<vmem>>, %arg5: memref<1x32xf32, #tpu.memory_space<vmem>>, %arg6: memref<8x32xf32, #tpu.memory_space<vmem>>) attributes {dimension_semantics = [#tpu.dimension_semantics<parallel>], iteration_bounds = array<i64: 2>, scalar_prefetch = 0 : i64, scratch_operands = 0 : i64, tpu.core_type = #tpu.core_type<tc>, window_params = [{transform_indices = @transform_0, window_bounds = array<i64: 8, 32>}, {transform_indices = @transform_1, window_bounds = array<i64: 8, 32>}, {pipeline_mode = #tpu.pipeline_mode<synchronous>, transform_indices = @transform_2, window_bounds = array<i64: 32, 32>}, {pipeline_mode = #tpu.pipeline_mode<synchronous>, transform_indices = @transform_3, window_bounds = array<i64: 32, 32>}, {pipeline_mode = #tpu.pipeline_mode<synchronous>, transform_indices = @transform_4, window_bounds = array<i64: 1, 32>}, {transform_indices = @transform_5, window_bounds = array<i64: 8, 32>}]} {
    %c0 = arith.constant 0 : index
    %c0_0 = arith.constant 0 : index
    %0 = vector.load %arg1[%c0, %c0_0] : memref<8x32xf32, #tpu.memory_space<vmem>>, vector<8x32xf32>
    %c0_1 = arith.constant 0 : index
    %c0_2 = arith.constant 0 : index
    %1 = vector.load %arg3[%c0_1, %c0_2] : memref<32x32xf32, #tpu.memory_space<vmem>>, vector<32x32xf32>
    %cst = arith.constant dense<0.000000e+00> : vector<8x32xf32>
    %2 = tpu.matmul %0, %1, %cst {dimension_numbers = #tpu.dot_dimension_numbers<[1], [0], [0], [1], [0, 0, 1, 1], [], []>} : vector<8x32xf32>, vector<32x32xf32>, vector<8x32xf32> -> vector<8x32xf32>
    %c0_3 = arith.constant 0 : index
    %c0_4 = arith.constant 0 : index
    %3 = vector.load %arg2[%c0_3, %c0_4] : memref<8x32xf32, #tpu.memory_space<vmem>>, vector<8x32xf32>
    %c0_5 = arith.constant 0 : index
    %c0_6 = arith.constant 0 : index
    %4 = vector.load %arg4[%c0_5, %c0_6] : memref<32x32xf32, #tpu.memory_space<vmem>>, vector<32x32xf32>
    %cst_7 = arith.constant dense<0.000000e+00> : vector<8x32xf32>
    %5 = tpu.matmul %3, %4, %cst_7 {dimension_numbers = #tpu.dot_dimension_numbers<[1], [0], [0], [1], [0, 0, 1, 1], [], []>} : vector<8x32xf32>, vector<32x32xf32>, vector<8x32xf32> -> vector<8x32xf32>
    %6 = arith.addf %2, %5 : vector<8x32xf32>
    %c0_8 = arith.constant 0 : index
    %c0_9 = arith.constant 0 : index
    %7 = vector.load %arg5[%c0_8, %c0_9] : memref<1x32xf32, #tpu.memory_space<vmem>>, vector<1x32xf32>
    %8 = vector.broadcast %7 : vector<1x32xf32> to vector<8x32xf32>
    %9 = arith.addf %6, %8 : vector<8x32xf32>
    %cst_10 = arith.constant 0.000000e+00 : f32
    %10 = vector.broadcast %cst_10 : f32 to vector<8x32xf32>
    %11 = arith.maximumf %9, %10 : vector<8x32xf32>
    %c0_11 = arith.constant 0 : index
    %c0_12 = arith.constant 0 : index
    %12 = vector.load %arg6[%c0_11, %c0_12] : memref<8x32xf32, #tpu.memory_space<vmem>>, vector<8x32xf32>
    tpu.vector_store %arg6[%c0_11, %c0_12], %11 {strides = array<i32>} : memref<8x32xf32, #tpu.memory_space<vmem>>, vector<8x32xf32>,
    return
  }
  func.func @transform_0(%arg0: i32) -> (i32, i32) {
    %c0_i32 = arith.constant 0 : i32
    %c0_i32_0 = arith.constant 0 : i32
    return %arg0, %c0_i32 : i32, i32
  }
  func.func @transform_1(%arg0: i32) -> (i32, i32) {
    %c0_i32 = arith.constant 0 : i32
    %c0_i32_0 = arith.constant 0 : i32
    return %arg0, %c0_i32 : i32, i32
  }
  func.func @transform_2(%arg0: i32) -> (i32, i32) {
    %c0_i32 = arith.constant 0 : i32
    %c0_i32_0 = arith.constant 0 : i32
    %c0_i32_1 = arith.constant 0 : i32
    return %c0_i32, %c0_i32_0 : i32, i32
  }
  func.func @transform_3(%arg0: i32) -> (i32, i32) {
    %c0_i32 = arith.constant 0 : i32
    %c0_i32_0 = arith.constant 0 : i32
    %c0_i32_1 = arith.constant 0 : i32
    return %c0_i32, %c0_i32_0 : i32, i32
  }
  func.func @transform_4(%arg0: i32) -> (i32, i32) {
    %c0_i32 = arith.constant 0 : i32
    %c0_i32_0 = arith.constant 0 : i32
    %c0_i32_1 = arith.constant 0 : i32
    return %c0_i32, %c0_i32_0 : i32, i32
  }
  func.func @transform_5(%arg0: i32) -> (i32, i32) {
    %c0_i32 = arith.constant 0 : i32
    %c0_i32_0 = arith.constant 0 : i32
    return %arg0, %c0_i32 : i32, i32
  }
}

</mosaic_0001>

<bundles_post_ra>
// kernel: tpu_custom_call.1
= control target key start
LH: loop header
LB: loop body
LE: loop exit
PB: predicated region body
PF: predicated region fallthrough
CT: control target
= control target key end

     0   :  { %s1023_s0 = inlined_call_operand.hbm [shape: f32[10,32], index: 0, kind: input, shape index: {}]   ;;  %s1024_s1 = inlined_call_operand.hbm [shape: f32[10,32], index: 1, kind: input, shape index: {}]   ;;  %s1025_s2 = inlined_call_operand.hbm [shape: f32[32,32], index: 2, kind: input, shape index: {}]   ;;  %s1026_s3 = inlined_call_operand.hbm [shape: f32[32,32], index: 3, kind: input, shape index: {}]   ;;  %s1027_s4 = inlined_call_operand.vmem [shape: f32[1,32], index: 4, kind: input, shape index: {}]   ;;  %s1028_s5 = inlined_call_operand.hbm [shape: f32[10,32], index: 5, kind: output, shape index: {}]  }
   0x1   :  { %1030 = sst [smem:[#allocation18_spill]] %s1025_s2 }
   0x2   :  { %1031 = sst [smem:[#allocation19_spill]] %s1026_s3 }
   0x3   :  { %10 = vsyncpa [#allocation3], 0 }
   0x4   :  { %12 = vsyncpa [#allocation3 + $0x1], 0 }
   0x5   :  { %13 = vsyncpa [#allocation6], 0 }
   0x6   :  { %15 = vsyncpa [#allocation6 + $0x1], 0 }
   0x7   :  { %16 = vsyncpa [#allocation9], 0 }
   0x8   :  { %17 = vsyncpa [#allocation4], 0 }
   0x9   :  { %19 = vsyncpa [#allocation4 + $0x1], 0  ;;  %s836_s18 = smov 0   ;;  %s838_s19 = smov 0  }
   0xa   :  { %s840_s20 = smov 0   ;;  %s842_s21 = smov 0  }
   0xb LB: > { %1032 = sst [smem:[#allocation16_spill]] %s796_s20  ;;  %s860_s25 = sadd.s32 4294967295, %s800_s21   ;;  %s800_s21 = sphi %s842_s21, %s1047_s21   ;;  %s796_s20 = sphi %s840_s20, %s1044_s20   ;;  %s792_s19 = sphi %s838_s19, %s1046_s19   ;;  %s788_s18 = sphi %s836_s18, %s1045_s18  }
   0xc   : > { %s1033_s2 = sld [smem:[#allocation18_spill]]  ;;  %p507_p0 = scmp.ge.s32.totalorder %s800_s21, 1 }
   0xd   : > { %p46_p1 = scmp.eq.s32.totalorder %s860_s25, 0  ;;  %p171_p2 = scmp.lt.s32.totalorder %s800_s21, 3 }
   0xe   : > { %s802_s27 = smov [#allocation7]   ;;  %s1035_s3 = sld [smem:[#allocation19_spill]] }
   0xf   : > { %p865_p3 = pnand %p507_p0, %p171_p2  ;;  %s184_s28 = sshll.u32 %s802_s27, 4  ;;  %s185_s28 = int_to_ptr.vmem [resolvable:$true] %s184_s28 }
  0x10   : > { %s803_s7 = smov [#allocation8]   ;;  %s804_s9 = smov 128  }
  0x11   : > { %p541_p4 = pneg %p865_p3  ;;  %s198_s8 = sshll.u32 %s803_s7, 4  ;;  %s199_s8 = int_to_ptr.vmem [resolvable:$true] %s198_s8 }
  0x12   : > { %s182_s24 = sshll.u32 %s1033_s2, 4  ;;  %s805_s10 = smov 8   ;;  %s183_s24 = int_to_ptr.hbm [resolvable:$true] %s182_s24 }
  0x13   : > { %p542_p6 = pnand %p541_p4, %p46_p1  ;;  %s506_s11 = sadd.s32 4294967294, %s800_s21  }
  0x14   : > { %s196_s6 = sshll.u32 %s1035_s3, 4  ;;  %s879_s12 = sadd.s32 1, %s800_s21   ;;  %s197_s6 = int_to_ptr.hbm [resolvable:$true] %s196_s6 }
  0x15   : > { %544 = dma.hbm_to_vmem [thread:$0]  (!%p542_p6), %s183_s24, 512, %s185_s28, [#allocation6], %s804_s9, %s804_s9, %s805_s10  }
  0x16   : > { %547 = dma.hbm_to_vmem [thread:$0]  (!%p542_p6), %s197_s6, 512, %s199_s8, [#allocation9], %s804_s9, %s804_s9, %s805_s10  }
  0x17   : > { %s29_s13 = ssub.s32 %s800_s21, %s879_s12  ;;  %s32_s14 = sadd.s32 1, %s796_s20 }
  0x18   : > { %p30_p7 = scmp.eq.s32.totalorder %s29_s13, 0  ;;  %p39_p8 = scmp.ne.s32.totalorder %s796_s20, %s792_s19 }
  0x19   : > { %p40_p9 = scmp.eq.s32.totalorder %s800_s21, 0  ;;  %p45_p10 = scmp.ne.s32.totalorder %s792_s19, %s788_s18 }
  0x1a   : > { %s890_s15 = scalar_select %p30_p7, %s796_s20, %s32_s14  }
  0x1b   : > { %p892_p11 = por %p40_p9, %p39_p8  ;;  %p898_p12 = por %p46_p1, %p45_p10 }
  0x1c   : > { %1036 = sst [smem:[#allocation17_spill]] %s890_s15  ;;  %p158_p13 = scmp.eq.s32.totalorder %s860_s25, 1 }
  0x1d   : > { %p164_p0 = scmp.eq.s32.totalorder %s506_s11, 1  ;;  %p561_p2 = scmp.lt.s32.totalorder %s800_s21, 2 }
  0x1e   : > { %s215_s22 = sand.u32 1, %s796_s20   ;;  %p905_p4 = por %p158_p13, %p39_p8 }
  0x1f   : > { %p909_p6 = por %p164_p0, %p45_p10  ;;  %s913_s27 = sshll.u32 %s215_s22, 3 }
  0x20   : > { %s512_s28 = sshll.u32 %s800_s21, 3  ;;  %s219_s7 = scalar_lea.vmem [#allocation2], %s913_s27 }
  0x21   : > { %s223_s6 = scalar_lea.hbm %s1023_s0, %s512_s28  ;;  %s227_s8 = sshll.u32 %s219_s7, 4  ;;  %s228_s8 = int_to_ptr.vmem [resolvable:$true] %s227_s8 }
  0x22   : > { %s225_s9 = sshll.u32 %s223_s6, 4  ;;  %p922_p7 = pnand %p561_p2, %p892_p11  ;;  %s226_s9 = int_to_ptr.hbm [resolvable:$true] %s225_s9 }
  0x23   : > { %s242_s14 = scalar_lea.hbm %s1024_s1, %s512_s28  ;;  %s234_s2 = sand.u32 1, %s800_s21  }
  0x24   : > { %s216_s3 = scalar_lea.sflag [#allocation3], %s215_s22  ;;  %s662_s29 = sshra.s32 %s226_s9, 4  ;;  %s663_s29 = int_to_ptr.hbm [resolvable:$true] %s662_s29 }
  0x25   : > { %s664_s30 = scalar_lea.hbm %s663_s29, 8  ;;  %p666_p9 = pneg %p922_p7 }
  0x26   : > { %p665_p8 = scmp.ne.s32.totalorder %s663_s29, %s664_s30  ;;  %s669_s7 = scalar_lea.hbm %s1023_s0, 16 }
  0x27   : > { %p670_p13 = scmp.lt.s32.totalorder %s663_s29, %s1023_s0  ;;  %p671_p0 = scmp.lt.s32.totalorder %s669_s7, %s664_s30 }
  0x28   : > { %p667_p10 = pnand %p666_p9, %p665_p8 }
  0x29   : > { %p672_p2 = por %p671_p0, %p670_p13 }
  0x2a   : > { %p668_p11 = pneg %p667_p10 }
  0x2c   : > { %p673_p5 = pnand %p672_p2, %p668_p11 }
  0x2e   : > { %676 = shalt.err (!%p673_p5)
}
  0x2f   : > { %551 = dma.hbm_to_vmem [thread:$0]  (!%p922_p7), %s226_s9, 128, %s228_s8, %s216_s3  }
  0x30   : > { %s244_s22 = sshll.u32 %s242_s14, 4  ;;  %s238_s28 = scalar_lea.vmem [#allocation5], %s913_s27  ;;  %s245_s22 = int_to_ptr.hbm [resolvable:$true] %s244_s22 }
  0x31   : > { %s246_s15 = sshll.u32 %s238_s28, 4  ;;  %s235_s16 = scalar_lea.sflag [#allocation6], %s234_s2  ;;  %s247_s15 = int_to_ptr.vmem [resolvable:$true] %s246_s15 }
  0x32   : > { %s692_s6 = sshra.s32 %s245_s22, 4  ;;  %s699_s7 = scalar_lea.hbm %s1024_s1, 16  ;;  %s693_s6 = int_to_ptr.hbm [resolvable:$true] %s692_s6 }
  0x33   : > { %s694_s20 = scalar_lea.hbm %s693_s6, 8  ;;  %p700_p5 = scmp.lt.s32.totalorder %s693_s6, %s1024_s1 }
  0x34   : > { %p695_p8 = scmp.ne.s32.totalorder %s693_s6, %s694_s20  ;;  %p701_p13 = scmp.lt.s32.totalorder %s699_s7, %s694_s20 }
  0x36   : > { %p697_p10 = pnand %p695_p8, %p666_p9  ;;  %p702_p0 = por %p701_p13, %p700_p5 }
  0x38   : > { %p698_p11 = pneg %p697_p10 }
  0x3a   : > { %p703_p2 = pnand %p702_p0, %p698_p11 }
  0x3c   : > { %706 = shalt.err (!%p703_p2)
}
  0x3d   : > { %554 = dma.hbm_to_vmem [thread:$0]  (!%p922_p7), %s245_s22, 128, %s247_s15, %s235_s16  }
  0x3e   : > { %255 = sbr.rel (%p865_p3) target bundleno = 219 (0xdb), region = 40  ;;  %s958_s2 = sand.u32 (!%p865_p3), 1, %s792_s19  }
  0x3f   : > { %s961_s27 = sshll.u32 (!%p865_p3), %s958_s2, 3  ;;  %s258_s8 = scalar_lea.sflag (!%p865_p3), [#allocation3], %s958_s2 }
  0x40   : > { %s261_s20 = scalar_lea.vmem (!%p865_p3), [#allocation2], %s961_s27 }
  0x43   : > { %767 = dma.done.wait (%p898_p12), %s258_s8, 128  }
  0x44   : > { %769 = vsyncadd (%p898_p12), %s258_s8, 4294967168  ;;  %s267_s26 = sand.u32 1, %s860_s25   ;;  %s271_s9 = scalar_lea.vmem [#allocation5], %s961_s27 }
  0x45   : > { %s268_s15 = scalar_lea.sflag [#allocation6], %s267_s26 }
  0x46   : > { %771 = dma.done.wait (%p898_p12), %s268_s15, 128  }
  0x47   : > { %773 = vsyncadd (%p898_p12), %s268_s15, 4294967168 }
  0x48   : > { %775 = dma.done.wait (%p46_p1), [#allocation6], 512  }
  0x49   : > { %777 = vsyncadd (%p46_p1), [#allocation6], 4294966784 }
  0x4a   : > { %779 = dma.done.wait (%p46_p1), [#allocation9], 512  }
  0x4b   : > { %781 = vsyncadd (%p46_p1), [#allocation9], 4294966784  ;;  %v323_v0 = vld [vmem:[#allocation8 + $0x18] sm:$0xff]  ;;  %v322_v2 = vld [vmem:[#allocation8 + $0x10] sm:$0xff]  ;;  %vm324_vm0 = vcmask 261120   ;;  %s524_s17 = sshll.u32 %s860_s25, 3 }
  0x4c   : > { %v318_v1 = vld [vmem:[#allocation7 + $0x18] sm:$0xff]  ;;  %340 = vmatpush.msra.mxu0 %v323_v0  ;;  %v317_v3 = vld [vmem:[#allocation7 + $0x10] sm:$0xff]  ;;  %v321_v4 = vld [vmem:[#allocation8 + $0x8] sm:$0xff]  ;;  %s389_s28 = scalar_lea.hbm %s1028_s5, %s524_s17  ;;  %s313_s16 = scalar_lea.vmem [#allocation10], %s961_s27 }
  0x4d   : > { %363 = vmatpush.msra.mxu1 %v318_v1  ;;  %v316_v5 = vld [vmem:[#allocation7 + $0x8] sm:$0xff]  ;;  %v320_v6 = vld [vmem:[#allocation8] sm:$0xff]  ;;  %v319_v8 = vld [vmem:[%s271_s9] sm:$0xff]  ;;  %s391_s6 = sshll.u32 %s313_s16, 4  ;;  %s393_s29 = sshll.u32 %s389_s28, 4  ;;  %s392_s6 = int_to_ptr.vmem [resolvable:$true] %s391_s6  ;;  %s394_s29 = int_to_ptr.hbm [resolvable:$true] %s393_s29 }
  0x4e   : > { %341 = vmatpush.msra.mxu0 %v322_v2  ;;  %v315_v7 = vld [vmem:[#allocation7] sm:$0xff]  ;;  %s379_s25 = scalar_lea.sflag [#allocation4], %s958_s2  ;;  %s736_s30 = sshra.s32 %s394_s29, 4  ;;  %s737_s30 = int_to_ptr.hbm [resolvable:$true] %s736_s30 }
  0x4f   : > { %364 = vmatpush.msra.mxu1 %v317_v3  ;;  %v314_v9 = vld [vmem:[%s261_s20] sm:$0xff]  ;;  %s738_s7 = scalar_lea.hbm %s737_s30, 8  ;;  %s742_s27 = scalar_lea.hbm %s1028_s5, 16 }
  0x50   : > { %342 = vmatpush.msra.mxu0 %v321_v4  ;;  %v601_v10 = vld [vmem:[%s1027_s4] ss:$0 sm:$0xff]  ;;  %p739_p1 = scmp.ne.s32.totalorder %s737_s30, %s738_s7  ;;  %p743_p7 = scmp.lt.s32.totalorder %s737_s30, %s1028_s5 }
  0x51   : > { %365 = vmatpush.msra.mxu1 %v316_v5  ;;  %p744_p9 = scmp.lt.s32.totalorder %s742_s27, %s738_s7 }
  0x52   : > { %343 = vmatpush.msra.mxu0 %v320_v6  ;;  %p740_p3 = pnand %p739_p1, %p905_p4 }
  0x53   : > { %366 = vmatpush.msra.mxu1 %v315_v7  ;;  %521 = vmatmul.msk.f32.vlgmr.msra.gmra.mxu0 %vm324_vm0, %v319_v8  ;;  %p745_p8 = por %p744_p9, %p743_p7 }
  0x54   : > { %522 = vmatmul.msk.f32.vlgmr.msra.gmra.mxu1 %vm324_vm0, %v314_v9  ;;  %p741_p12 = pneg %p740_p3 }
  0x56   : > { %p746_p10 = pnand %p745_p8, %p741_p12 }
  0xd0   : > { %v345_v11 = vpop.f32.mrf.mxu0 }
  0xd1   : > { %v368_v12 = vpop.f32.mrf.mxu1 }
  0xd2   : > { %v369_v13 = vadd.f32 %v368_v12, %v345_v11 }
  0xd4   : > { %v375_v14 = vadd.f32 %v601_v10, %v369_v13 }
  0xd6   : > { %v376_v15 = vmax.f32 %v375_v14, 0.0 }
  0xd8   : > { %377 = vst.msk [vmem:[%s313_s16] sm:$0xff] %vm324_vm0, %v376_v15 }
  0xd9   : > { %749 = shalt.err (!%p746_p10)
}
  0xda   : > { %539 = dma.vmem_to_hbm [thread:$0]  (%p905_p4), %s392_s6, 128, %s394_s29, %s379_s25  }
  0xdb PF: > { %s405_s2 = sand.u32 1, %s788_s18   ;;  %p1042_p11 = scmp.ge.s32.totalorder %s800_s21, 2 }
  0xdc   : > { %s406_s26 = scalar_lea.sflag [#allocation4], %s405_s2 }
  0xdd   : > { %p556_p5 = pnand %p1042_p11, %p909_p6 }
  0xdf   : > { %p557_p13 = pneg %p556_p5 }
  0xe1   : > { %783 = dma.done.wait (%p557_p13), %s406_s26, 128  }
  0xe2   : > { %785 = vsyncadd (%p557_p13), %s406_s26, 4294967168  ;;  %s1043_s15 = sld [smem:[#allocation16_spill]]  ;;  %p22_p0 = scmp.ge.s32.totalorder %s879_s12, 4  }
  0xe3   : > { %s1044_s20 = sld [smem:[#allocation17_spill]]  ;;  %s1045_s18 = smov %s792_s19 }
  0xe4   : > { %s1047_s21 = smov %s879_s12  ;;  %24 = sbr.rel (!%p22_p0) target bundleno = 11 (0xb), region = 106 }
  0xe8   : > { %s1046_s19 = smov %s1043_s15 }
  0xe9   :  { %412 = vsyncpa [#allocation3], 1 }
  0xea   :  { %414 = vsyncpa [#allocation3 + $0x1], 1 }
  0xeb   :  { %415 = vsyncpa [#allocation6], 1 }
  0xec   :  { %417 = vsyncpa [#allocation6 + $0x1], 1 }
  0xed   :  { %418 = vsyncpa [#allocation9], 1 }
  0xee   :  { %419 = vsyncpa [#allocation4], 1 }
  0xef   :  { %421 = vsyncpa [#allocation4 + $0x1], 1 }

</bundles_post_ra>
